<compile_context>
chip_gen: v5e
topology: v5e:2x2
jax: 0.10.0
libtpu: 0.0.40
codegen_flags: <defaults>
</compile_context>

<pallas_src>
import functools

import jax
import jax.numpy as jnp
from jax.experimental import pallas as pl
from jax.experimental.pallas import tpu as pltpu

_A = -0.75  # PyTorch's bicubic convolution coefficient


def _cubic_weights(t):
    """4 cubic-convolution weights (taps at floor-1 .. floor+2) for fraction t."""
    def cc1(s):  # |s| <= 1
        return ((_A + 2.0) * s - (_A + 3.0)) * s * s + 1.0

    def cc2(s):  # 1 < |s| < 2
        return ((_A * s - 5.0 * _A) * s + 8.0 * _A) * s - 4.0 * _A

    return (cc2(t + 1.0), cc1(t), cc1(1.0 - t), cc2(2.0 - t))


def _grid_sample_bicubic_kernel(x_ref, coef_ref, out_ref, *, H_in, W_in, NCb):
    # x_ref   : (NCb*H_in, W_in)  f32  — one NC block of the input, flattened 2-D
    # coef_ref: (10, TILE_P)      f32  — rows: [iy0-1, ix0-1, wy0..wy3, wx0..wx3]
    # out_ref : (NCb, TILE_P)     f32  — lane-dense output block
    cf = coef_ref[...]
    tile_p = cf.shape[1]

    ybase = cf[0:1, :].astype(jnp.int32)   # (1, TILE_P)  first row tap index
    xbase = cf[1:2, :].astype(jnp.int32)   # (1, TILE_P)  first col tap index

    iota_h = jax.lax.broadcasted_iota(jnp.int32, (H_in, tile_p), 0)
    iota_w = jax.lax.broadcasted_iota(jnp.int32, (W_in, tile_p), 0)

    # Weighted one-hot selectors, built directly in (spatial, lane) orientation.
    # Out-of-bounds tap indices never match the iota -> zeros padding for free.
    row_sel = jnp.zeros((H_in, tile_p), jnp.float32)
    col_sel = jnp.zeros((W_in, tile_p), jnp.float32)
    for k in range(4):
        row_sel = row_sel + jnp.where(iota_h == ybase + k, cf[2 + k:3 + k, :], 0.0)
        col_sel = col_sel + jnp.where(iota_w == xbase + k, cf[6 + k:7 + k, :], 0.0)

    # Stage 1 (MXU): contract W_in.   (NCb*H, W) @ (W, TILE_P) -> (NCb*H, TILE_P)
    t0 = jnp.dot(x_ref[...], col_sel, preferred_element_type=jnp.float32)

    # Stage 2 (VPU): per-pixel row weights, reduce over H (lane-dense throughout).
    t0 = t0.reshape(NCb, H_in, tile_p)
    out_ref[...] = jnp.sum(t0 * row_sel[None, :, :], axis=1)   # (NCb, TILE_P)


def _pick_nc_block(nc, h, w, tile_p, budget_bytes=8 << 20):
    """Largest NC block that keeps the per-step working set small and respects
    the (8,128) sublane rule for the (ncb*H, W) / (ncb, TILE_P) blocks."""
    candidates = [d for d in range(nc, 0, -1)
                  if nc % d == 0 and (d == nc or d % 8 == 0)]
    for d in candidates:
        per_step = (2 * d * h * w          # x block (double-buffered)
                    + d * h * tile_p       # t0 intermediate
                    + 2 * d * tile_p       # output block (double-buffered)
                    + 2 * 10 * tile_p      # coefficient block
                    + (h + w) * tile_p     # selectors
                    ) * 4
        if per_step <= budget_bytes:
            return d
    return candidates[-1]


def directional_transform_forward(x, transform):
    """Pallas equivalent of DirectionalTransform.forward (bicubic grid_sample)."""
    N, C, H_in, W_in = x.shape
    Ng, H_out, W_out, two = transform.shape
    assert two == 2
    assert N == Ng == 1, "grid_sample requires grid batch == input batch (module uses 1)"

    P = H_out * W_out
    NC = N * C

    # --- hoist per-pixel coordinate / cubic-weight math to the wrapper --------
    gx = transform[0, :, :, 0].reshape(P).astype(jnp.float32)   # width coord
    gy = transform[0, :, :, 1].reshape(P).astype(jnp.float32)   # height coord
    # unnormalize (align_corners=False):  ((coord + 1) * size - 1) / 2
    ix = ((gx + 1.0) * W_in - 1.0) * 0.5
    iy = ((gy + 1.0) * H_in - 1.0) * 0.5
    ixf = jnp.floor(ix)
    iyf = jnp.floor(iy)
    wx = _cubic_weights(ix - ixf)   # 4 x (P,)
    wy = _cubic_weights(iy - iyf)
    coef = jnp.stack([iyf - 1.0, ixf - 1.0, *wy, *wx], axis=0)   # (10, P)

    # --- tiling ----------------------------------------------------------------
    # TODO(synk): re-derive TILE_P / NC block / vmem limit per TPU generation
    # (bigger tiles on v5e/v6e, tighter on v7x's 64 MiB VMEM).
    TILE_P = 256 if P >= 512 else 128
    P_pad = pl.cdiv(P, TILE_P) * TILE_P
    if P_pad != P:
        coef = jnp.pad(coef, ((0, 0), (0, P_pad - P)))   # zero weights -> zero out

    NCb = _pick_nc_block(NC, H_in, W_in, TILE_P)
    grid = (NC // NCb, P_pad // TILE_P)   # P axis innermost: x block stays resident

    x2d = x.reshape(NC * H_in, W_in).astype(jnp.float32)

    out_full = pl.pallas_call(
        functools.partial(_grid_sample_bicubic_kernel,
                          H_in=H_in, W_in=W_in, NCb=NCb),
        out_shape=jax.ShapeDtypeStruct((NC, P_pad), jnp.float32),
        grid=grid,
        in_specs=[
            pl.BlockSpec((NCb * H_in, W_in), lambda c, p: (c, 0)),
            pl.BlockSpec((10, TILE_P), lambda c, p: (0, p)),
        ],
        out_specs=pl.BlockSpec((NCb, TILE_P), lambda c, p: (c, p)),
        compiler_params=pltpu.CompilerParams(
            dimension_semantics=("parallel", "parallel"),
            vmem_limit_bytes=32 * 1024 * 1024,
        ),
    )(x2d, coef)

    # Lane-dense (NC, P) result reshapes straight to NCHW — no transpose.
    return out_full[:, :P].reshape(N, C, H_out, W_out)


def make_transform_param(h, w):
    """Deterministic parameter init, identical to DirectionalTransform.__init__."""
    xs = jnp.arange(h, dtype=jnp.float32) / (h - 1)
    ys = jnp.arange(w, dtype=jnp.float32) / (w - 1)
    gi, gj = jnp.meshgrid(xs, ys, indexing="ij")          # torch.meshgrid default 'ij'
    grid = jnp.stack([gi, gj], axis=-1) * 2.0 - 1.0        # torch.dstack(...) * 2 - 1
    return grid[None]                                      # (1, h, w, 2)


def _ref_grid_sample_bicubic(x, transform):
    """Pure-JAX reference (explicit 16-tap gather) for correctness checking."""
    N, C, H, W = x.shape
    _, H_out, W_out, _ = transform.shape
    gx = transform[0, :, :, 0].reshape(-1)
    gy = transform[0, :, :, 1].reshape(-1)
    ix = ((gx + 1.0) * W - 1.0) * 0.5
    iy = ((gy + 1.0) * H - 1.0) * 0.5
    ixf = jnp.floor(ix)
    iyf = jnp.floor(iy)
    wx = _cubic_weights(ix - ixf)
    wy = _cubic_weights(iy - iyf)
    ix0 = ixf.astype(jnp.int32)
    iy0 = iyf.astype(jnp.int32)
    xf = x.reshape(N * C, H * W)
    out = jnp.zeros((N * C, H_out * W_out), jnp.float32)
    for k in range(4):
        r = iy0 - 1 + k
        rv = ((r >= 0) & (r < H)).astype(jnp.float32)
        rc = jnp.clip(r, 0, H - 1)
        for l in range(4):
            c = ix0 - 1 + l
            cv = ((c >= 0) & (c < W)).astype(jnp.float32)
            cc = jnp.clip(c, 0, W - 1)
            vals = xf[:, rc * W + cc]                 # (NC, P)
            w = wy[k] * wx[l] * rv * cv               # (P,)
            out = out + vals * w[None, :]
    return out.reshape(N, C, H_out, W_out)


if __name__ == "__main__":
    # Small shapes consistent with the module: the transform batch is 1, so x
    # must be batch 1; spatial size == c0's spatial size used in __init__.
    N, C, H, W = 1, 4, 16, 16
    key = jax.random.PRNGKey(0)
    kx, kt = jax.random.split(key)
    x = jax.random.normal(kx, (N, C, H, W), dtype=jnp.float32)

    # Case 1: the identity mesh-grid parameter exactly as __init__ builds it.
    transform_id = make_transform_param(H, W)
    out_id = jax.block_until_ready(directional_transform_forward(x, transform_id))
    ref_id = _ref_grid_sample_bicubic(x, transform_id)
    assert out_id.shape == (N, C, H, W)
    assert jnp.allclose(out_id, ref_id, atol=1e-4, rtol=1e-4), \
        float(jnp.abs(out_id - ref_id).max())

    # Case 2: a perturbed (asymmetric, partly out-of-range) grid, as a learned
    # transform parameter would be after training steps.
    transform_pert = transform_id + 0.3 * jax.random.normal(
        kt, transform_id.shape, dtype=jnp.float32)
    out_p = jax.block_until_ready(directional_transform_forward(x, transform_pert))
    ref_p = _ref_grid_sample_bicubic(x, transform_pert)
    assert jnp.allclose(out_p, ref_p, atol=1e-4, rtol=1e-4), \
        float(jnp.abs(out_p - ref_p).max())

    print("KERNEL_OK")
</pallas_src>

<mosaic_0001>
module attributes {stable_mosaic.version = 11 : i64} {
  func.func @_grid_sample_bicubic_kernel(%arg0: i32, %arg1: i32, %arg2: memref<64x16xf32, #tpu.memory_space<vmem>>, %arg3: memref<10x128xf32, #tpu.memory_space<vmem>>, %arg4: memref<4x128xf32, #tpu.memory_space<vmem>>) attributes {dimension_semantics = [#tpu.dimension_semantics<parallel>, #tpu.dimension_semantics<parallel>], iteration_bounds = array<i64: 1, 2>, scalar_prefetch = 0 : i64, scratch_operands = 0 : i64, tpu.core_type = #tpu.core_type<tc>, window_params = [{transform_indices = @transform_0, window_bounds = array<i64: 64, 16>}, {transform_indices = @transform_1, window_bounds = array<i64: 10, 128>}, {transform_indices = @transform_2, window_bounds = array<i64: 4, 128>}]} {
    %c0 = arith.constant 0 : index
    %c0_0 = arith.constant 0 : index
    %0 = vector.load %arg3[%c0, %c0_0] : memref<10x128xf32, #tpu.memory_space<vmem>>, vector<10x128xf32>
    %1 = vector.extract_strided_slice %0 {offsets = [0, 0], sizes = [1, 128], strides = [1, 1]} : vector<10x128xf32> to vector<1x128xf32>
    %2 = arith.fptosi %1 : vector<1x128xf32> to vector<1x128xi32>
    %3 = vector.extract_strided_slice %0 {offsets = [1, 0], sizes = [1, 128], strides = [1, 1]} : vector<10x128xf32> to vector<1x128xf32>
    %4 = arith.fptosi %3 : vector<1x128xf32> to vector<1x128xi32>
    %5 = tpu.iota {dimensions = array<i32: 0>} : vector<16x128xi32>
    %6 = tpu.iota {dimensions = array<i32: 0>} : vector<16x128xi32>
    %cst = arith.constant 0.000000e+00 : f32
    %7 = vector.broadcast %cst : f32 to vector<16x128xf32>
    %cst_1 = arith.constant 0.000000e+00 : f32
    %8 = vector.broadcast %cst_1 : f32 to vector<16x128xf32>
    %c0_i32 = arith.constant 0 : i32
    %9 = vector.broadcast %c0_i32 : i32 to vector<1x128xi32>
    %10 = arith.addi %2, %9 : vector<1x128xi32>
    %11 = vector.broadcast %10 : vector<1x128xi32> to vector<16x128xi32>
    %12 = arith.cmpi eq, %5, %11 : vector<16x128xi32>
    %13 = vector.extract_strided_slice %0 {offsets = [2, 0], sizes = [1, 128], strides = [1, 1]} : vector<10x128xf32> to vector<1x128xf32>
    %cst_2 = arith.constant 0.000000e+00 : f32
    %14 = vector.shape_cast %13 : vector<1x128xf32> to vector<1x128xf32>
    %15 = vector.broadcast %14 : vector<1x128xf32> to vector<16x128xf32>
    %16 = vector.broadcast %cst_2 : f32 to vector<16x128xf32>
    %17 = arith.select %12, %15, %16 : vector<16x128xi1>, vector<16x128xf32>
    %18 = arith.addf %7, %17 : vector<16x128xf32>
    %c0_i32_3 = arith.constant 0 : i32
    %19 = vector.broadcast %c0_i32_3 : i32 to vector<1x128xi32>
    %20 = arith.addi %4, %19 : vector<1x128xi32>
    %21 = vector.broadcast %20 : vector<1x128xi32> to vector<16x128xi32>
    %22 = arith.cmpi eq, %6, %21 : vector<16x128xi32>
    %23 = vector.extract_strided_slice %0 {offsets = [6, 0], sizes = [1, 128], strides = [1, 1]} : vector<10x128xf32> to vector<1x128xf32>
    %cst_4 = arith.constant 0.000000e+00 : f32
    %24 = vector.shape_cast %23 : vector<1x128xf32> to vector<1x128xf32>
    %25 = vector.broadcast %24 : vector<1x128xf32> to vector<16x128xf32>
    %26 = vector.broadcast %cst_4 : f32 to vector<16x128xf32>
    %27 = arith.select %22, %25, %26 : vector<16x128xi1>, vector<16x128xf32>
    %28 = arith.addf %8, %27 : vector<16x128xf32>
    %c1_i32 = arith.constant 1 : i32
    %29 = vector.broadcast %c1_i32 : i32 to vector<1x128xi32>
    %30 = arith.addi %2, %29 : vector<1x128xi32>
    %31 = vector.broadcast %30 : vector<1x128xi32> to vector<16x128xi32>
    %32 = arith.cmpi eq, %5, %31 : vector<16x128xi32>
    %33 = vector.extract_strided_slice %0 {offsets = [3, 0], sizes = [1, 128], strides = [1, 1]} : vector<10x128xf32> to vector<1x128xf32>
    %cst_5 = arith.constant 0.000000e+00 : f32
    %34 = vector.shape_cast %33 : vector<1x128xf32> to vector<1x128xf32>
    %35 = vector.broadcast %34 : vector<1x128xf32> to vector<16x128xf32>
    %36 = vector.broadcast %cst_5 : f32 to vector<16x128xf32>
    %37 = arith.select %32, %35, %36 : vector<16x128xi1>, vector<16x128xf32>
    %38 = arith.addf %18, %37 : vector<16x128xf32>
    %c1_i32_6 = arith.constant 1 : i32
    %39 = vector.broadcast %c1_i32_6 : i32 to vector<1x128xi32>
    %40 = arith.addi %4, %39 : vector<1x128xi32>
    %41 = vector.broadcast %40 : vector<1x128xi32> to vector<16x128xi32>
    %42 = arith.cmpi eq, %6, %41 : vector<16x128xi32>
    %43 = vector.extract_strided_slice %0 {offsets = [7, 0], sizes = [1, 128], strides = [1, 1]} : vector<10x128xf32> to vector<1x128xf32>
    %cst_7 = arith.constant 0.000000e+00 : f32
    %44 = vector.shape_cast %43 : vector<1x128xf32> to vector<1x128xf32>
    %45 = vector.broadcast %44 : vector<1x128xf32> to vector<16x128xf32>
    %46 = vector.broadcast %cst_7 : f32 to vector<16x128xf32>
    %47 = arith.select %42, %45, %46 : vector<16x128xi1>, vector<16x128xf32>
    %48 = arith.addf %28, %47 : vector<16x128xf32>
    %c2_i32 = arith.constant 2 : i32
    %49 = vector.broadcast %c2_i32 : i32 to vector<1x128xi32>
    %50 = arith.addi %2, %49 : vector<1x128xi32>
    %51 = vector.broadcast %50 : vector<1x128xi32> to vector<16x128xi32>
    %52 = arith.cmpi eq, %5, %51 : vector<16x128xi32>
    %53 = vector.extract_strided_slice %0 {offsets = [4, 0], sizes = [1, 128], strides = [1, 1]} : vector<10x128xf32> to vector<1x128xf32>
    %cst_8 = arith.constant 0.000000e+00 : f32
    %54 = vector.shape_cast %53 : vector<1x128xf32> to vector<1x128xf32>
    %55 = vector.broadcast %54 : vector<1x128xf32> to vector<16x128xf32>
    %56 = vector.broadcast %cst_8 : f32 to vector<16x128xf32>
    %57 = arith.select %52, %55, %56 : vector<16x128xi1>, vector<16x128xf32>
    %58 = arith.addf %38, %57 : vector<16x128xf32>
    %c2_i32_9 = arith.constant 2 : i32
    %59 = vector.broadcast %c2_i32_9 : i32 to vector<1x128xi32>
    %60 = arith.addi %4, %59 : vector<1x128xi32>
    %61 = vector.broadcast %60 : vector<1x128xi32> to vector<16x128xi32>
    %62 = arith.cmpi eq, %6, %61 : vector<16x128xi32>
    %63 = vector.extract_strided_slice %0 {offsets = [8, 0], sizes = [1, 128], strides = [1, 1]} : vector<10x128xf32> to vector<1x128xf32>
    %cst_10 = arith.constant 0.000000e+00 : f32
    %64 = vector.shape_cast %63 : vector<1x128xf32> to vector<1x128xf32>
    %65 = vector.broadcast %64 : vector<1x128xf32> to vector<16x128xf32>
    %66 = vector.broadcast %cst_10 : f32 to vector<16x128xf32>
    %67 = arith.select %62, %65, %66 : vector<16x128xi1>, vector<16x128xf32>
    %68 = arith.addf %48, %67 : vector<16x128xf32>
    %c3_i32 = arith.constant 3 : i32
    %69 = vector.broadcast %c3_i32 : i32 to vector<1x128xi32>
    %70 = arith.addi %2, %69 : vector<1x128xi32>
    %71 = vector.broadcast %70 : vector<1x128xi32> to vector<16x128xi32>
    %72 = arith.cmpi eq, %5, %71 : vector<16x128xi32>
    %73 = vector.extract_strided_slice %0 {offsets = [5, 0], sizes = [1, 128], strides = [1, 1]} : vector<10x128xf32> to vector<1x128xf32>
    %cst_11 = arith.constant 0.000000e+00 : f32
    %74 = vector.shape_cast %73 : vector<1x128xf32> to vector<1x128xf32>
    %75 = vector.broadcast %74 : vector<1x128xf32> to vector<16x128xf32>
    %76 = vector.broadcast %cst_11 : f32 to vector<16x128xf32>
    %77 = arith.select %72, %75, %76 : vector<16x128xi1>, vector<16x128xf32>
    %78 = arith.addf %58, %77 : vector<16x128xf32>
    %c3_i32_12 = arith.constant 3 : i32
    %79 = vector.broadcast %c3_i32_12 : i32 to vector<1x128xi32>
    %80 = arith.addi %4, %79 : vector<1x128xi32>
    %81 = vector.broadcast %80 : vector<1x128xi32> to vector<16x128xi32>
    %82 = arith.cmpi eq, %6, %81 : vector<16x128xi32>
    %83 = vector.extract_strided_slice %0 {offsets = [9, 0], sizes = [1, 128], strides = [1, 1]} : vector<10x128xf32> to vector<1x128xf32>
    %cst_13 = arith.constant 0.000000e+00 : f32
    %84 = vector.shape_cast %83 : vector<1x128xf32> to vector<1x128xf32>
    %85 = vector.broadcast %84 : vector<1x128xf32> to vector<16x128xf32>
    %86 = vector.broadcast %cst_13 : f32 to vector<16x128xf32>
    %87 = arith.select %82, %85, %86 : vector<16x128xi1>, vector<16x128xf32>
    %88 = arith.addf %68, %87 : vector<16x128xf32>
    %c0_14 = arith.constant 0 : index
    %c0_15 = arith.constant 0 : index
    %89 = vector.load %arg2[%c0_14, %c0_15] : memref<64x16xf32, #tpu.memory_space<vmem>>, vector<64x16xf32>
    %cst_16 = arith.constant dense<0.000000e+00> : vector<64x128xf32>
    %90 = tpu.matmul %89, %88, %cst_16 {dimension_numbers = #tpu.dot_dimension_numbers<[1], [0], [0], [1], [0, 0, 1, 1], [], []>} : vector<64x16xf32>, vector<16x128xf32>, vector<64x128xf32> -> vector<64x128xf32>
    %91 = vector.shape_cast %90 : vector<64x128xf32> to vector<4x16x128xf32>
    %92 = vector.shape_cast %78 : vector<16x128xf32> to vector<1x16x128xf32>
    %93 = vector.broadcast %92 : vector<1x16x128xf32> to vector<4x16x128xf32>
    %94 = arith.mulf %91, %93 : vector<4x16x128xf32>
    %cst_17 = arith.constant dense<0.000000e+00> : vector<4x128xf32>
    %95 = vector.multi_reduction <add>, %94, %cst_17 [1] : vector<4x16x128xf32> to vector<4x128xf32>
    %c0_18 = arith.constant 0 : index
    %c0_19 = arith.constant 0 : index
    %96 = vector.load %arg4[%c0_18, %c0_19] : memref<4x128xf32, #tpu.memory_space<vmem>>, vector<4x128xf32>
    tpu.vector_store %arg4[%c0_18, %c0_19], %95 {strides = array<i32>} : memref<4x128xf32, #tpu.memory_space<vmem>>, vector<4x128xf32>,
    return
  }
  func.func @transform_0(%arg0: i32, %arg1: i32) -> (i32, i32) {
    %c0_i32 = arith.constant 0 : i32
    %c0_i32_0 = arith.constant 0 : i32
    return %arg0, %c0_i32 : i32, i32
  }
  func.func @transform_1(%arg0: i32, %arg1: i32) -> (i32, i32) {
    %c0_i32 = arith.constant 0 : i32
    %c0_i32_0 = arith.constant 0 : i32
    return %c0_i32, %arg1 : i32, i32
  }
  func.func @transform_2(%arg0: i32, %arg1: i32) -> (i32, i32) {
    %c0_i32 = arith.constant 0 : i32
    return %arg0, %arg1 : i32, i32
  }
}

</mosaic_0001>

<bundles_post_ra>
// kernel: tpu_custom_call.1
= control target key start
LH: loop header
LB: loop body
LE: loop exit
PB: predicated region body
PF: predicated region fallthrough
CT: control target
= control target key end

     0   :  { %7 = vsyncpa [#allocation4], 0  ;;  %s908_s0 = inlined_call_operand.vmem [shape: f32[64,16], index: 0, kind: input, shape index: {}]   ;;  %s909_s1 = inlined_call_operand.vmem [shape: f32[10,256], index: 1, kind: input, shape index: {}]   ;;  %s910_s2 = inlined_call_operand.hbm [shape: f32[4,256], index: 2, kind: output, shape index: {}]  }
   0x1   :  { %9 = vsyncpa [#allocation4 + $0x1], 0  ;;  %s703_s9 = smov 0   ;;  %s705_s10 = smov 0  }
   0x2   :  { %s707_s11 = smov 0   ;;  %s709_s12 = smov 0  }
   0x3   :  { %s711_s13 = smov 0   ;;  %s713_s14 = smov 0  }
   0x4 LB: > { %s520_s15 = sadd.s32 4294967295, %s686_s14   ;;  %s521_s16 = sadd.s32 4294967294, %s686_s14   ;;  %s686_s14 = sphi %s713_s14, %s15_s14   ;;  %s682_s13 = sphi %s711_s13, %s919_s13   ;;  %s678_s12 = sphi %s709_s12, %s918_s12   ;;  %s674_s11 = sphi %s707_s11, %s917_s11   ;;  %s670_s10 = sphi %s705_s10, %s916_s10   ;;  %s666_s9 = sphi %s703_s9, %s915_s9  }
   0x5   : > { %s24_s17 = sadd.s32 1, %s682_s13  ;;  %s60_s18 = sadd.s32 1, %s674_s11 }
   0x6   : > { %p25_p0 = scmp.ge.s32.totalorder %s24_s17, 2  ;;  %p67_p1 = scmp.ne.s32.totalorder %s674_s11, %s670_s10 }
   0x7   : > { %p68_p2 = scmp.eq.s32.totalorder %s686_s14, 0  ;;  %p99_p3 = scmp.eq.s32.totalorder %s520_s15, 1 }
   0x8   : > { %s921_s17 = smov (%p25_p0, %s24_s17), 0  ;;  %p104_p6 = scmp.ne.s32.totalorder %s670_s10, %s666_s9 }
   0x9   : > { %p69_p4 = por %p68_p2, %p67_p1  ;;  %p742_p5 = por %p99_p3, %p67_p1 }
   0xa   : > { %s57_s20 = ssub.s32 %s682_s13, %s921_s17  ;;  %p105_p8 = scmp.eq.s32.totalorder %s521_s16, 1 }
   0xb   : > { %p58_p7 = scmp.eq.s32.totalorder %s57_s20, 0  ;;  %p524_p10 = scmp.ge.s32.totalorder %s686_s14, 2 }
   0xc   : > { %p753_p9 = por %p105_p8, %p104_p6 }
   0xd   : > { %s751_s21 = scalar_select %p58_p7, %s674_s11, %s60_s18  }
   0xe   : > { %130 = sbr.rel (%p524_p10) target bundleno = 25 (0x19), region = 20 }
  0x13   : > { %133 = sbr.rel (!%p69_p4) target bundleno = 25 (0x19), region = 24  ;;  %s135_s23 = sand.u32 (%p69_p4), 1, %s674_s11  }
  0x14   : > { %s526_s24 = sshll.u32 (%p69_p4), %s682_s13, 3  ;;  %s525_s25 = sshll.u32 (%p69_p4), %s135_s23, 4 }
  0x15   : > { %s139_s28 = scalar_lea.vmem (%p69_p4), %s909_s1, %s526_s24  ;;  %s137_s29 = scalar_lea.vmem (%p69_p4), [#allocation2], %s525_s25 }
  0x16   : > { %v170_v0 = vld [vmem:[%s139_s28] sm:$0xff] (%p69_p4)  ;;  %v172_v1 = vld [vmem:[%s139_s28 + $0x10] sm:$0xff] (%p69_p4) }
  0x17   : > { %171 = vst [vmem:[%s137_s29] sm:$0xff] (%p69_p4), %v170_v0 }
  0x18   : > { %173 = vst [vmem:[%s137_s29 + $0x8] sm:$0xff] %v172_v1 }
  0x19 PF: > { %p527_p11 = scmp.ge.s32.totalorder %s686_s14, 1  ;;  %p178_p12 = scmp.lt.s32.totalorder %s686_s14, 3 }
  0x1b   : > { %p179_p13 = pnand %p527_p11, %p178_p12 }
  0x1c   : > { %s768_s30 = sand.u32 (!%p179_p13), 1, %s670_s10   ;;  %s539_s5 = sshll.u32 (!%p179_p13), %s678_s12, 2 }
  0x1d   : > { %182 = sbr.rel (%p179_p13) target bundleno = 218 (0xda), region = 62  ;;  %s528_s3 = sshll.u32 (!%p179_p13), %s768_s30, 4 }
  0x1e   : > { %s187_s4 = scalar_lea.vmem (!%p179_p13), [#allocation2], %s528_s3  ;;  %s425_s8 = scalar_lea.hbm (!%p179_p13), %s910_s2, %s539_s5 }
  0x1f   : > { %s429_s18 = sshll.u32 (!%p179_p13), %s425_s8, 4  ;;  %s413_s12 = scalar_lea.sflag (!%p179_p13), [#allocation4], %s768_s30  ;;  %s430_s18 = int_to_ptr.hbm [resolvable:$true] %s429_s18 }
  0x20   : > { %s622_s20 = sshra.s32 (!%p179_p13), %s430_s18, 4  ;;  %s628_s26 = scalar_lea.hbm (!%p179_p13), %s910_s2, 8  ;;  %s623_s20 = int_to_ptr.hbm [resolvable:$true] %s622_s20 }
  0x21   : > { %s624_s23 = scalar_lea.hbm (!%p179_p13), %s623_s20, 4  ;;  %p629_p3 = scmp.lt.s32.totalorder (!%p179_p13), %s623_s20, %s910_s2 }
  0x22   : > { %v220_v2 = vlaneseq  ;;  %v771_v3 = vld [vmem:[%s187_s4] sm:$0xff]  ;;  %v218_v7 = vld [vmem:[%s187_s4 + $0x8] sm:$0x3]  ;;  %vm298_vm13 = vcmask 130048   ;;  %s529_s4 = sshll.u32 %s768_s30, 2  ;;  %p625_p0 = scmp.ne.s32.totalorder %s623_s20, %s624_s23 }
  0x23   : > { %vm548_vm0 = vcmp.lt.s32.totalorder %v771_v3, 0  ;;  %v549_v5 = vceil.f32 %v771_v3  ;;  %v550_v6 = vfloor.f32 %v771_v3  ;;  %v234_v11 = vperm.slane %v771_v3, 6  ;;  %v290_v51 = vld [vmem:[%s908_s0] sm:$0xff]  ;;  %v292_v52 = vld [vmem:[%s908_s0 + $0x10] sm:$0xff]  ;;  %v291_v56 = vld [vmem:[%s908_s0 + $0x8] sm:$0xff]  ;;  %s210_s15 = scalar_lea.vmem [#allocation3], %s529_s4  ;;  %p630_p4 = scmp.lt.s32.totalorder %s628_s26, %s624_s23 }
  0x24   : > { %v221_v4 = vshrl.u32 %v220_v2, 7  ;;  %v251_v12 = vperm.slane %v771_v3, 7  ;;  %v268_v13 = vperm.slane %v218_v7, 0  ;;  %v285_v14 = vperm.slane %v218_v7, 1  ;;  %v294_v53 = vld [vmem:[%s908_s0 + $0x20] sm:$0xff]  ;;  %v296_v54 = vld [vmem:[%s908_s0 + $0x30] sm:$0xff]  ;;  %p626_p1 = pnand %p625_p0, %p742_p5 }
  0x25   : > { %v551_v8 = vsel %vm548_vm0, %v549_v5, %v550_v6  ;;  %v226_v15 = vperm.slane %v771_v3, 2  ;;  %v243_v21 = vperm.slane %v771_v3, 3  ;;  %v260_v22 = vperm.slane %v771_v3, 4  ;;  %v293_v57 = vld [vmem:[%s908_s0 + $0x18] sm:$0xff]  ;;  %v295_v58 = vld [vmem:[%s908_s0 + $0x28] sm:$0xff]  ;;  %s427_s16 = sshll.u32 %s210_s15, 4  ;;  %p631_p6 = por %p630_p4, %p629_p3  ;;  %s428_s16 = int_to_ptr.vmem [resolvable:$true] %s427_s16 }
  0x26   : > { %v776_v9 = vcvt.f32.s32 %v551_v8  ;;  %v778_v10 = vadd.s32 8, %v221_v4  ;;  %v277_v23 = vperm.slane %v771_v3, 5  ;;  %v297_v59 = vld [vmem:[%s908_s0 + $0x38] sm:$0xff]  ;;  %p627_p2 = pneg %p626_p1 }
  0x28   : > { %v231_v16 = vperm.slane %v776_v9, 1  ;;  %v785_v17 = vadd.s32 1, %v776_v9  ;;  %v788_v18 = vadd.s32 2, %v776_v9  ;;  %v791_v19 = vadd.s32 3, %v776_v9  ;;  %p632_p7 = pnand %p631_p6, %p627_p2 }
  0x29   : > { %v223_v20 = vperm.slane %v776_v9, 0 }
  0x2a   : > { %vm233_vm1 = vcmp.eq.s32.totalorder %v778_v10, %v231_v16  ;;  %v248_v24 = vperm.slane %v785_v17, 1  ;;  %v265_v25 = vperm.slane %v788_v18, 1  ;;  %v282_v26 = vperm.slane %v791_v19, 1 }
  0x2b   : > { %v236_v27 = vsel %vm233_vm1, %v234_v11, 0.0  ;;  %vm232_vm2 = vcmp.eq.s32.totalorder %v221_v4, %v231_v16  ;;  %vm803_vm3 = vcmp.eq.s32.totalorder %v221_v4, %v223_v20  ;;  %v240_v29 = vperm.slane %v785_v17, 0 }
  0x2c   : > { %vm250_vm4 = vcmp.eq.s32.totalorder %v778_v10, %v248_v24  ;;  %vm267_vm5 = vcmp.eq.s32.totalorder %v778_v10, %v265_v25  ;;  %vm284_vm6 = vcmp.eq.s32.totalorder %v778_v10, %v282_v26  ;;  %v235_v30 = vsel %vm232_vm2, %v234_v11, 0.0 }
  0x2d   : > { %v253_v31 = vsel %vm250_vm4, %v251_v12, 0.0  ;;  %v270_v32 = vsel %vm267_vm5, %v268_v13, 0.0  ;;  %v287_v33 = vsel %vm284_vm6, %v285_v14, 0.0  ;;  %vm249_vm7 = vcmp.eq.s32.totalorder %v221_v4, %v248_v24 }
  0x2e   : > { %v255_v34 = vadd.f32 %v253_v31, %v236_v27  ;;  %v252_v35 = vsel %vm249_vm7, %v251_v12, 0.0  ;;  %vm266_vm8 = vcmp.eq.s32.totalorder %v221_v4, %v265_v25  ;;  %vm283_vm9 = vcmp.eq.s32.totalorder %v221_v4, %v282_v26 }
  0x2f   : > { %v254_v36 = vadd.f32 %v252_v35, %v235_v30  ;;  %v269_v37 = vsel %vm266_vm8, %v268_v13, 0.0  ;;  %v286_v38 = vsel %vm283_vm9, %v285_v14, 0.0  ;;  %v227_v39 = vsel %vm803_vm3, %v226_v15, 0.0 }
  0x30   : > { %v272_v40 = vadd.f32 %v270_v32, %v255_v34  ;;  %vm241_vm10 = vcmp.eq.s32.totalorder %v221_v4, %v240_v29  ;;  %v257_v41 = vperm.slane %v788_v18, 0  ;;  %v274_v42 = vperm.slane %v791_v19, 0 }
  0x31   : > { %v271_v43 = vadd.f32 %v269_v37, %v254_v36  ;;  %v244_v44 = vsel %vm241_vm10, %v243_v21, 0.0  ;;  %vm225_vm14 = vcmp.eq.s32.totalorder %v778_v10, %v223_v20  ;;  %vm242_vm15 = vcmp.eq.s32.totalorder %v778_v10, %v240_v29 }
  0x32   : > { %v289_v45 = vadd.f32 %v287_v33, %v272_v40  ;;  %v246_v46 = vadd.f32 %v244_v44, %v227_v39  ;;  %vm258_vm11 = vcmp.eq.s32.totalorder %v221_v4, %v257_v41  ;;  %vm275_vm12 = vcmp.eq.s32.totalorder %v221_v4, %v274_v42 }
  0x33   : > { %v288_v47 = vadd.f32 %v286_v38, %v271_v43  ;;  %v261_v48 = vsel %vm258_vm11, %v260_v22, 0.0  ;;  %v278_v49 = vsel %vm275_vm12, %v277_v23, 0.0  ;;  %v228_v60 = vsel %vm225_vm14, %v226_v15, 0.0 }
  0x34   : > { %337 = vmatpush.msra.mxu0 %v289_v45  ;;  %542 = vmatpush.msra.mxu1 %v289_v45  ;;  %v263_v50 = vadd.f32 %v261_v48, %v246_v46  ;;  %v245_v61 = vsel %vm242_vm15, %v243_v21, 0.0  ;;  %vm259_vm0 = vcmp.eq.s32.totalorder %v778_v10, %v257_v41  ;;  %vm276_vm1 = vcmp.eq.s32.totalorder %v778_v10, %v274_v42 }
  0x35   : > { %543 = vmatpush.msra.mxu2 %v289_v45  ;;  %544 = vmatpush.msra.mxu3 %v289_v45  ;;  %v247_v62 = vadd.f32 %v245_v61, %v228_v60  ;;  %v262_v63 = vsel %vm259_vm0, %v260_v22, 0.0  ;;  %v279_v1 = vsel %vm276_vm1, %v277_v23, 0.0  ;;  %vm404_vm2 = vcmask 1041409  }
  0x36   : > { %338 = vmatpush.msra.mxu0 %v288_v47  ;;  %545 = vmatpush.msra.mxu1 %v288_v47  ;;  %v280_v55 = vadd.f32 %v278_v49, %v263_v50  ;;  %vm406_vm3 = vcmask 1042434   ;;  %vm408_vm4 = vcmask 1043459  }
  0x37   : > { %546 = vmatpush.msra.mxu2 %v288_v47  ;;  %547 = vmatpush.msra.mxu3 %v288_v47  ;;  %v264_v0 = vadd.f32 %v262_v63, %v247_v62 }
  0x38   : > { %530 = vmatmul.msk.f32.vlgmr.msra.gmra.mxu0 %vm298_vm13, %v290_v51  ;;  %532 = vmatmul.msk.f32.vlgmr.msra.gmra.mxu1 %vm298_vm13, %v292_v52 }
  0x39   : > { %534 = vmatmul.msk.f32.vlgmr.msra.gmra.mxu2 %vm298_vm13, %v294_v53  ;;  %536 = vmatmul.msk.f32.vlgmr.msra.gmra.mxu3 %vm298_vm13, %v296_v54  ;;  %v281_v2 = vadd.f32 %v279_v1, %v264_v0 }
  0x40   : > { %531 = vmatmul.msk.f32.gmra.mxu0 %vm298_vm13, %v291_v56  ;;  %533 = vmatmul.msk.f32.gmra.mxu1 %vm298_vm13, %v293_v57 }
  0x41   : > { %535 = vmatmul.msk.f32.gmra.mxu2 %vm298_vm13, %v295_v58  ;;  %537 = vmatmul.msk.f32.gmra.mxu3 %vm298_vm13, %v297_v59 }
  0xb5   : > { %v340_v4 = vpop.f32.mrf.mxu0  ;;  %v346_v5 = vpop.f32.mrf.mxu1 }
  0xb6   : > { %v364_v11 = vmul.f32 %v340_v4, %v280_v55  ;;  %v366_v12 = vmul.f32 %v346_v5, %v280_v55 }
  0xbc   : > { %v352_v6 = vpop.f32.mrf.mxu2  ;;  %v358_v7 = vpop.f32.mrf.mxu3 }
  0xbd   : > { %v343_v8 = vpop.f32.mrf.mxu0  ;;  %v349_v9 = vpop.f32.mrf.mxu1  ;;  %v368_v21 = vmul.f32 %v352_v6, %v280_v55  ;;  %v370_v22 = vmul.f32 %v358_v7, %v280_v55 }
  0xbe   : > { %v365_v13 = vmul.f32 %v343_v8, %v281_v2  ;;  %v367_v14 = vmul.f32 %v349_v9, %v281_v2 }
  0xc0   : > { %v372_v15 = vadd.f32 %v365_v13, %v364_v11  ;;  %v379_v16 = vadd.f32 %v367_v14, %v366_v12 }
  0xc2   : > { %v373_v17 = vrot.slane %v372_v15, 4  ;;  %v380_v18 = vrot.slane %v379_v16, 4 }
  0xc4   : > { %v374_v19 = vadd.f32 %v373_v17, %v372_v15  ;;  %v381_v10 = vadd.f32 %v380_v18, %v379_v16  ;;  %v355_v20 = vpop.f32.mrf.mxu2  ;;  %v361_v3 = vpop.f32.mrf.mxu3 }
  0xc5   : > { %v369_v23 = vmul.f32 %v355_v20, %v281_v2  ;;  %v371_v24 = vmul.f32 %v361_v3, %v281_v2 }
  0xc6   : > { %v375_v25 = vrot.slane %v374_v19, 2  ;;  %v382_v26 = vrot.slane %v381_v10, 2 }
  0xc7   : > { %v386_v27 = vadd.f32 %v369_v23, %v368_v21  ;;  %v393_v28 = vadd.f32 %v371_v24, %v370_v22 }
  0xc8   : > { %v376_v29 = vadd.f32 %v375_v25, %v374_v19  ;;  %v383_v30 = vadd.f32 %v382_v26, %v381_v10 }
  0xc9   : > { %v387_v31 = vrot.slane %v386_v27, 4  ;;  %v394_v32 = vrot.slane %v393_v28, 4 }
  0xca   : > { %v377_v33 = vrot.slane %v376_v29, 1  ;;  %v384_v34 = vrot.slane %v383_v30, 1 }
  0xcb   : > { %v388_v35 = vadd.f32 %v387_v31, %v386_v27  ;;  %v395_v36 = vadd.f32 %v394_v32, %v393_v28 }
  0xcc   : > { %v378_v37 = vadd.f32 %v377_v33, %v376_v29  ;;  %v385_v38 = vadd.f32 %v384_v34, %v383_v30 }
  0xcd   : > { %v389_v39 = vrot.slane %v388_v35, 2  ;;  %v396_v40 = vrot.slane %v395_v36, 2 }
  0xce   : > { %v405_v41 = vsel %vm404_vm2, %v385_v38, %v378_v37 }
  0xcf   : > { %v390_v42 = vadd.f32 %v389_v39, %v388_v35  ;;  %v397_v43 = vadd.f32 %v396_v40, %v395_v36 }
  0xd1   : > { %v391_v44 = vrot.slane %v390_v42, 1  ;;  %v398_v45 = vrot.slane %v397_v43, 1 }
  0xd3   : > { %v392_v46 = vadd.f32 %v391_v44, %v390_v42  ;;  %v399_v47 = vadd.f32 %v398_v45, %v397_v43 }
  0xd5   : > { %v407_v48 = vsel %vm406_vm3, %v392_v46, %v405_v41 }
  0xd6   : > { %v409_v49 = vsel %vm408_vm4, %v399_v47, %v407_v48 }
  0xd7   : > { %411 = vst [vmem:[%s210_s15] sm:$0xf] %v409_v49 }
  0xd8   : > { %635 = shalt.err (!%p632_p7)
}
  0xd9   : > { %553 = dma.vmem_to_hbm [thread:$0]  (%p742_p5), %s428_s16, 64, %s430_s18, %s413_s12  }
  0xda PF: > { %s441_s30 = sand.u32 1, %s666_s9   ;;  %p556_p8 = pnand %p524_p10, %p753_p9 }
  0xdb   : > { %s442_s29 = scalar_lea.sflag [#allocation4], %s441_s30 }
  0xdc   : > { %p557_p11 = pneg %p556_p8 }
  0xde   : > { %661 = dma.done.wait (%p557_p11), %s442_s29, 64  }
  0xdf   : > { %663 = vsyncadd (%p557_p11), %s442_s29, 4294967232  ;;  %s15_s14 = sadd.s32 1, %s686_s14   ;;  %s915_s9 = smov %s670_s10 }
  0xe0   : > { %p12_p12 = scmp.ge.s32.totalorder %s15_s14, 4   ;;  %s916_s10 = smov %s674_s11 }
  0xe1   : > { %s917_s11 = smov %s751_s21  ;;  %s918_s12 = smov %s682_s13 }
  0xe2   : > { %s919_s13 = smov %s921_s17  ;;  %14 = sbr.rel (!%p12_p12) target bundleno = 4 (0x4), region = 109 }
  0xe7   :  { %448 = vsyncpa [#allocation4], 1 }
  0xe8   :  { %450 = vsyncpa [#allocation4 + $0x1], 1 }

</bundles_post_ra>
